<compile_context>
chip_gen: v7x
topology: tpu7x:2x2x1
jax: 0.10.0
libtpu: 0.0.40
codegen_flags: <defaults>
</compile_context>

<pallas_src>
import functools

import jax
import jax.numpy as jnp
import numpy as np
from jax.experimental import pallas as pl
from jax.experimental.pallas import tpu as pltpu


# -----------------------------------------------------------------------------
# Kernels (each launched as a single grid point; whole arrays resident in VMEM).
# -----------------------------------------------------------------------------

def _embed_kernel(idx_ref, table_ref, o_ref):
    """Embedding lookup as one-hot @ table (MXU-friendly gather, tiny vocab)."""
    idx = idx_ref[...]                                        # (N, 1) int32
    n, _ = idx.shape
    v = table_ref.shape[0]
    iota = jax.lax.broadcasted_iota(jnp.int32, (n, v), 1)
    onehot = jnp.where(iota == idx, 1.0, 0.0).astype(jnp.float32)
    o_ref[...] = jnp.dot(onehot, table_ref[...],
                         preferred_element_type=jnp.float32)


def _linear_kernel(x_ref, w_ref, b_ref, o_ref, *, activation=None):
    """y = act(x @ w + b) — one batched MXU matmul over all rows."""
    y = jnp.dot(x_ref[...], w_ref[...],
                preferred_element_type=jnp.float32) + b_ref[...]
    if activation is not None:
        y = activation(y)
    o_ref[...] = y.astype(o_ref.dtype)


def _dual_linear_kernel(x1_ref, x2_ref, w1_ref, w2_ref, o_ref):
    """y = x1 @ w1 + x2 @ w2 — algebraic split of concat([x1, x2]) @ W."""
    o_ref[...] = (
        jnp.dot(x1_ref[...], w1_ref[...], preferred_element_type=jnp.float32)
        + jnp.dot(x2_ref[...], w2_ref[...], preferred_element_type=jnp.float32)
    ).astype(o_ref.dtype)


def _gru_kernel(xproj_ref, whh_f_ref, whh_b_ref, bhh_f_ref, bhh_b_ref, o_ref):
    """Bidirectional GRU recurrence.

    xproj_ref: (S, B, 6H)  precomputed x @ W_ih^T + b_ih; forward gates in
               [:, :, :3H], backward gates in [:, :, 3H:], gate order (r, z, n).
    o_ref    : (S, B, 2H)  forward hidden in [..., :H], backward in [..., H:].
    Only the sequential h @ W_hh^T work is done per step (unrolled; S static).
    """
    s_len, b_dim, h6 = xproj_ref.shape
    h_dim = h6 // 6

    whh_f = whh_f_ref[...]            # (H, 3H)
    whh_b = whh_b_ref[...]
    bhh_f = bhh_f_ref[...]            # (1, 3H)
    bhh_b = bhh_b_ref[...]

    def sigmoid(x):
        return 1.0 / (1.0 + jnp.exp(-x))

    def cell(xp, h, whh, bhh):
        hp = jnp.dot(h, whh, preferred_element_type=jnp.float32) + bhh
        r = sigmoid(xp[:, :h_dim] + hp[:, :h_dim])
        z = sigmoid(xp[:, h_dim:2 * h_dim] + hp[:, h_dim:2 * h_dim])
        n = jnp.tanh(xp[:, 2 * h_dim:] + r * hp[:, 2 * h_dim:])
        return (1.0 - z) * n + z * h

    h = jnp.zeros((b_dim, h_dim), jnp.float32)
    for t in range(s_len):                       # forward direction
        h = cell(xproj_ref[t][:, :3 * h_dim], h, whh_f, bhh_f)
        o_ref[t, :, :h_dim] = h

    h = jnp.zeros((b_dim, h_dim), jnp.float32)
    for t in range(s_len - 1, -1, -1):           # backward direction
        h = cell(xproj_ref[t][:, 3 * h_dim:], h, whh_b, bhh_b)
        o_ref[t, :, h_dim:] = h


def _mha_kernel(q_ref, k_ref, v_ref, o_ref, *, scale):
    """Batched multi-head attention core on (B*heads, S, depth) operands."""
    q = q_ref[...] * scale
    logits = jnp.einsum('bqd,bkd->bqk', q, k_ref[...],
                        preferred_element_type=jnp.float32)
    m = jnp.max(logits, axis=-1, keepdims=True)
    p = jnp.exp(logits - m)
    denom = jnp.sum(p, axis=-1, keepdims=True)
    w = p * pl.reciprocal(denom, approx=False)   # approx=True is fine in prod
    o_ref[...] = jnp.einsum('bqk,bkd->bqd', w, v_ref[...],
                            preferred_element_type=jnp.float32).astype(o_ref.dtype)


# -----------------------------------------------------------------------------
# pallas_call wrappers
# -----------------------------------------------------------------------------

def _vmem_call(kernel, out_shape, n_in):
    """Single-grid-point pallas_call with full-array VMEM blocks."""
    return pl.pallas_call(
        kernel,
        out_shape=out_shape,
        in_specs=[pl.BlockSpec(memory_space=pltpu.MemorySpace.VMEM)] * n_in,
        out_specs=pl.BlockSpec(memory_space=pltpu.MemorySpace.VMEM),
    )


def embed_lookup(idx, table):
    n = idx.shape[0]
    e = table.shape[1]
    return _vmem_call(_embed_kernel,
                      jax.ShapeDtypeStruct((n, e), jnp.float32), 2)(idx, table)


def linear(x, w, b=None, activation=None):
    m = x.shape[0]
    n = w.shape[1]
    if b is None:
        b = jnp.zeros((1, n), jnp.float32)
    kern = functools.partial(_linear_kernel, activation=activation)
    return _vmem_call(kern, jax.ShapeDtypeStruct((m, n), jnp.float32), 3)(x, w, b)


def dual_linear(x1, x2, w1, w2):
    m = x1.shape[0]
    n = w1.shape[1]
    return _vmem_call(_dual_linear_kernel,
                      jax.ShapeDtypeStruct((m, n), jnp.float32), 4)(x1, x2, w1, w2)


def gru_bidirectional(xproj, whh_f, whh_b, bhh_f, bhh_b):
    s, b, h6 = xproj.shape
    h = h6 // 6
    return _vmem_call(_gru_kernel,
                      jax.ShapeDtypeStruct((s, b, 2 * h), jnp.float32),
                      5)(xproj, whh_f, whh_b, bhh_f, bhh_b)


def multi_head_attention(q, k, v, scale):
    kern = functools.partial(_mha_kernel, scale=scale)
    return _vmem_call(kern, jax.ShapeDtypeStruct(q.shape, jnp.float32), 3)(q, k, v)


# -----------------------------------------------------------------------------
# Full forward pass (Pallas)
# -----------------------------------------------------------------------------

def encoder_with_selfattn_forward(src, params):
    """src: (src_len, batch) int32 (PyTorch layout).

    Returns (outputs, hidden):
      outputs: (src_len, batch, 2*enc_hid)   (same layout PyTorch returns)
      hidden : (batch, dec_hid)
    """
    s_len, b = src.shape
    n = s_len * b
    emb_w = params['emb']
    e = emb_w.shape[1]
    gru = params['gru']
    n_layer = len(gru)
    h = gru[0]['w_hh_f'].shape[1]
    nh = params['n_heads']
    depth = h // nh
    d_out = params['fc_w'].shape[0]

    # Time-major flatten: row = s * B + b.  With this layout the PyTorch
    # src.transpose(0, 1) at entry and net.transpose(0, 1) at exit are no-ops.
    idx = src.reshape(n, 1).astype(jnp.int32)
    emb_flat = embed_lookup(idx, emb_w)                                  # (N, E)

    x_flat = emb_flat
    outputs = None
    hidden = None
    for l in range(n_layer):
        g = gru[l]
        # Both directions' input projections (b_ih folded) as ONE batched matmul.
        wih = jnp.concatenate([g['w_ih_f'].T, g['w_ih_b'].T], axis=1)    # (in, 6H)
        bih = jnp.concatenate([g['b_ih_f'], g['b_ih_b']]).reshape(1, 6 * h)
        xproj = linear(x_flat, wih, bih).reshape(s_len, b, 6 * h)
        gru_out = gru_bidirectional(xproj, g['w_hh_f'].T, g['w_hh_b'].T,
                                    g['b_hh_f'].reshape(1, 3 * h),
                                    g['b_hh_b'].reshape(1, 3 * h))       # (S, B, 2H)

        if l < n_layer - 1:
            # Bidirectional projection: Linear(2H -> H), no bias.
            net_flat = linear(gru_out.reshape(n, 2 * h), params['proj'][l].T)

            # Self-attention.  q & k share their input -> fuse into one matmul;
            # v's input cat([embedded, net]) -> algebraically split dual matmul.
            wqk = jnp.concatenate([params['wq'][l].T, params['wk'][l].T], axis=1)
            qk = linear(net_flat, wqk)                                   # (N, 2H)
            q_flat, k_flat = qk[:, :h], qk[:, h:]
            wv = params['wv'][l]
            v_flat = dual_linear(emb_flat, net_flat, wv[:, :e].T, wv[:, e:].T)

            def split_heads(x):
                return (x.reshape(s_len, b, nh, depth)
                         .transpose(1, 2, 0, 3)
                         .reshape(b * nh, s_len, depth))

            attn = multi_head_attention(split_heads(q_flat), split_heads(k_flat),
                                        split_heads(v_flat), depth ** -0.5)
            # Combine heads back into the time-major flat layout (N, H).
            x_flat = (attn.reshape(b, nh, s_len, depth)
                          .transpose(2, 0, 1, 3)
                          .reshape(n, h))
        else:
            # Last layer: gru_out is already [src_len, batch, 2H]; its last
            # time step feeds fc (+ tanh), fused into the linear kernel.
            outputs = gru_out
            hidden = linear(gru_out[s_len - 1], params['fc_w'].T,
                            params['fc_b'].reshape(1, d_out),
                            activation=jnp.tanh)                          # (B, D)
    return outputs, hidden


# -----------------------------------------------------------------------------
# Pure-JAX reference mirroring the PyTorch forward (eval mode)
# -----------------------------------------------------------------------------

def _gru_layer_reference(x, g, h_dim):
    b, _, _ = x.shape

    def run(seq, w_ih, w_hh, b_ih, b_hh):
        def cell(h, xt):
            gi = xt @ w_ih.T + b_ih
            gh = h @ w_hh.T + b_hh
            r = jax.nn.sigmoid(gi[:, :h_dim] + gh[:, :h_dim])
            z = jax.nn.sigmoid(gi[:, h_dim:2 * h_dim] + gh[:, h_dim:2 * h_dim])
            c = jnp.tanh(gi[:, 2 * h_dim:] + r * gh[:, 2 * h_dim:])
            h_new = (1.0 - z) * c + z * h
            return h_new, h_new

        h0 = jnp.zeros((b, h_dim), jnp.float32)
        _, hs = jax.lax.scan(cell, h0, jnp.transpose(seq, (1, 0, 2)))
        return jnp.transpose(hs, (1, 0, 2))

    out_f = run(x, g['w_ih_f'], g['w_hh_f'], g['b_ih_f'], g['b_hh_f'])
    out_b = run(x[:, ::-1, :], g['w_ih_b'], g['w_hh_b'],
                g['b_ih_b'], g['b_hh_b'])[:, ::-1, :]
    return jnp.concatenate([out_f, out_b], axis=-1)


def _self_attention_reference(q_in, k_in, v_in, wq, wk, wv, nh):
    b, s_len, _ = q_in.shape
    h_dim = wq.shape[0]
    depth = h_dim // nh
    q = q_in @ wq.T
    k = k_in @ wk.T
    v = v_in @ wv.T

    def split(x):
        return (x.reshape(b, s_len, nh, depth)
                 .transpose(0, 2, 1, 3)
                 .reshape(b * nh, s_len, depth))

    q, k, v = split(q), split(k), split(v)
    q = q * depth ** -0.5
    logits = jnp.einsum('bqd,bkd->bqk', q, k)
    w = jax.nn.softmax(logits, axis=-1)
    out = jnp.einsum('bqk,bkd->bqd', w, v)
    return (out.reshape(b, nh, s_len, depth)
               .transpose(0, 2, 1, 3)
               .reshape(b, s_len, h_dim))


def encoder_with_selfattn_reference(src, params):
    emb_w = params['emb']
    gru = params['gru']
    n_layer = len(gru)
    h_dim = gru[0]['w_hh_f'].shape[1]
    nh = params['n_heads']

    embedded = jnp.transpose(emb_w[src], (1, 0, 2))        # (B, S, E)
    net = embedded
    for l in range(n_layer):
        net = _gru_layer_reference(net, gru[l], h_dim)     # (B, S, 2H)
        if l < n_layer - 1:
            net = net @ params['proj'][l].T                # (B, S, H)
            v_in = jnp.concatenate([embedded, net], axis=2)
            net = _self_attention_reference(net, net, v_in,
                                            params['wq'][l], params['wk'][l],
                                            params['wv'][l], nh)
    outputs = jnp.transpose(net, (1, 0, 2))                # (S, B, 2H)
    hidden = jnp.tanh(net[:, -1, :] @ params['fc_w'].T + params['fc_b'])
    return outputs, hidden


# -----------------------------------------------------------------------------
# Test harness
# -----------------------------------------------------------------------------

if __name__ == "__main__":
    # Small deterministic shapes consistent with the module:
    # input_dim (vocab) = 20, emb_dim = 16, enc_hid = 32, dec_hid = 32,
    # n_layer = 2, n_heads = 4, batch = 2, src_len = 8.
    V, E, H, D = 20, 16, 32, 32
    n_layer, n_heads = 2, 4
    B, S = 2, 8

    key = jax.random.PRNGKey(0)
    keys = iter(jax.random.split(key, 40))

    def u(shape, scale=0.2):
        return jax.random.uniform(next(keys), shape, jnp.float32, -scale, scale)

    emb_w = jax.random.normal(next(keys), (V, E), jnp.float32) * 0.5

    gru_params = []
    in_dims = [E] + [H] * (n_layer - 1)
    for l in range(n_layer):
        gru_params.append({
            'w_ih_f': u((3 * H, in_dims[l])), 'w_hh_f': u((3 * H, H)),
            'b_ih_f': u((3 * H,)),            'b_hh_f': u((3 * H,)),
            'w_ih_b': u((3 * H, in_dims[l])), 'w_hh_b': u((3 * H, H)),
            'b_ih_b': u((3 * H,)),            'b_hh_b': u((3 * H,)),
        })

    params = {
        'emb': emb_w,
        'gru': gru_params,
        'proj': [u((H, 2 * H)) for _ in range(n_layer - 1)],
        'wq': [u((H, H)) for _ in range(n_layer - 1)],
        'wk': [u((H, H)) for _ in range(n_layer - 1)],
        'wv': [u((H, E + H)) for _ in range(n_layer - 1)],
        'fc_w': u((D, 2 * H)),
        'fc_b': u((D,)),
        'n_heads': n_heads,
    }

    src = jax.random.randint(next(keys), (S, B), 0, V, dtype=jnp.int32)

    outputs, hidden = encoder_with_selfattn_forward(src, params)
    outputs, hidden = jax.block_until_ready((outputs, hidden))

    ref_outputs, ref_hidden = encoder_with_selfattn_reference(src, params)
    np.testing.assert_allclose(np.asarray(outputs), np.asarray(ref_outputs),
                               rtol=1e-3, atol=1e-4)
    np.testing.assert_allclose(np.asarray(hidden), np.asarray(ref_hidden),
                               rtol=1e-3, atol=1e-4)
    assert outputs.shape == (S, B, 2 * H)
    assert hidden.shape == (B, D)
    print("KERNEL_OK")
</pallas_src>

<mosaic_0001>
module attributes {stable_mosaic.version = 11 : i64} {
  func.func @_embed_kernel(%arg0: memref<16x1xi32, #tpu.memory_space<vmem>>, %arg1: memref<20x16xf32, #tpu.memory_space<vmem>>, %arg2: memref<16x16xf32, #tpu.memory_space<vmem>>) attributes {dimension_semantics = [], scalar_prefetch = 0 : i64, scratch_operands = 0 : i64, tpu.core_type = #tpu.core_type<tc>} {
    %c0 = arith.constant 0 : index
    %c0_0 = arith.constant 0 : index
    %0 = vector.load %arg0[%c0, %c0_0] : memref<16x1xi32, #tpu.memory_space<vmem>>, vector<16x1xi32>
    %1 = tpu.iota {dimensions = array<i32: 1>} : vector<16x20xi32>
    %2 = vector.broadcast %0 : vector<16x1xi32> to vector<16x20xi32>
    %3 = arith.cmpi eq, %1, %2 : vector<16x20xi32>
    %cst = arith.constant 1.000000e+00 : f32
    %cst_1 = arith.constant 0.000000e+00 : f32
    %4 = vector.broadcast %cst : f32 to vector<16x20xf32>
    %5 = vector.broadcast %cst_1 : f32 to vector<16x20xf32>
    %6 = arith.select %3, %4, %5 : vector<16x20xi1>, vector<16x20xf32>
    %c0_2 = arith.constant 0 : index
    %c0_3 = arith.constant 0 : index
    %7 = vector.load %arg1[%c0_2, %c0_3] : memref<20x16xf32, #tpu.memory_space<vmem>>, vector<20x16xf32>
    %cst_4 = arith.constant dense<0.000000e+00> : vector<16x16xf32>
    %8 = tpu.matmul %6, %7, %cst_4 {dimension_numbers = #tpu.dot_dimension_numbers<[1], [0], [0], [1], [0, 0, 1, 1], [], []>} : vector<16x20xf32>, vector<20x16xf32>, vector<16x16xf32> -> vector<16x16xf32>
    %c0_5 = arith.constant 0 : index
    %c0_6 = arith.constant 0 : index
    %9 = vector.load %arg2[%c0_5, %c0_6] : memref<16x16xf32, #tpu.memory_space<vmem>>, vector<16x16xf32>
    tpu.vector_store %arg2[%c0_5, %c0_6], %8 {strides = array<i32>} : memref<16x16xf32, #tpu.memory_space<vmem>>, vector<16x16xf32>,
    return
  }
}

</mosaic_0001>

<bundles_post_ra>
// kernel: tpu_custom_call.1
= control target key start
LH: loop header
LB: loop body
LE: loop exit
PB: predicated region body
PF: predicated region fallthrough
CT: control target
= control target key end

     0   :  { %v185_v2 = vmov 0   ;;  %s232_s0 = inlined_call_operand.vmem [shape: s32[16,1], index: 0, kind: input, shape index: {}]   ;;  %s233_s1 = inlined_call_operand.vmem [shape: f32[20,16], index: 1, kind: input, shape index: {}]   ;;  %s234_s2 = inlined_call_operand.hbm [shape: f32[16,16], index: 2, kind: output, shape index: {}]  }
   0x1   :  { %v12_v0 = vld [vmem:[%s232_s0] sm:$0xff]  ;;  %160 = vset.pattern.permute.xlu0 %v185_v2  ;;  %v27_v3 = vld [vmem:[%s233_s1 + $0x8] sm:$0xff] }
   0x2   :  { %v26_v1 = vld [vmem:[%s233_s1] sm:$0xff] }
   0x3   :  { %7 = vsyncpa [#allocation3], 0  ;;  %17 = vperm.xlu0 %160, %v12_v0   ;;  %v151_v4 = vpack.c.bf16 %v27_v3, %v26_v1  ;;  %v13_v5 = vld [vmem:[%s232_s0 + $0x8] sm:$0xff]  ;;  %v28_v6 = vld [vmem:[%s233_s1 + $0x10] sm:$0xf]  ;;  %vm36_vm0 = vcmask 1043456   ;;  %v14_v7 = vlaneseq }
   0x4   :  { %vm29_vm1 = vcmask 162816   ;;  %v186_v10 = vmov 0.0   ;;  %s187_s0 = smov [#allocation2]   ;;  %vm115_vm4 = vcmask 130048  }
   0x5   :  { %152 = vmatprep.subr.bf16.mxu0 %v151_v4  ;;  %v15_v8 = vand.u32 127, %v14_v7  ;;  %s123_s19 = sshll.u32 %s187_s0, 4  ;;  %s124_s19 = int_to_ptr.vmem [resolvable:$true] %s123_s19 }
   0x6   :  { %154 = vmatpush3.bf16.msra.mxu0 %v151_v4  ;;  %s161_s1 = scalar_lea.vmem %s124_s19, 256  ;;  %p166_p1 = scmp.lt.s32.totalorder %s124_s19, %s124_s19 }
   0x7   :  { %20 = vperm.xlu0 %160, %v13_v5   ;;  %146 = vmatprep.subr.msk.mxu0 %vm36_vm0, %v28_v6  ;;  %p162_p0 = scmp.ne.s32.totalorder %s124_s19, %s161_s1  ;;  %p167_p2 = scmp.lt.s32.totalorder %s161_s1, %s161_s1 }
   0x9   :  { %p168_p3 = por %p167_p2, %p166_p1 }
   0xa   :  { %147 = vmatpush3.msk.msra.mxu0 %vm36_vm0, %v28_v6 }
   0xb   :  { %p169_p4 = pnand %p168_p3, %p162_p0 }
  0x82   :  { %v18_v9 = vpop.permute.xlu0 %17 }
  0x83   :  { %vm22_vm2 = vcmp.eq.s32.totalorder %v15_v8, %v18_v9 }
  0x84   :  { %v24_v11 = vsel %vm22_vm2, 1.0, %v186_v10 }
  0x85   :  { %148 = vmatprep.mubr.msk.f32.mxu0 %vm29_vm1, %v24_v11 }
  0x86   :  { %v21_v12 = vpop.permute.xlu0 %20 }
  0x87   :  { %vm23_vm3 = vcmp.eq.s32.totalorder %v15_v8, %v21_v12 }
  0x88   :  { %v25_v13 = vsel %vm23_vm3, 1.0, %v186_v10 }
  0x89   :  { %149 = vmatmul.mubr.msk.f32.vlgmr.msra.gmra.mrb[0].mxu0 %vm29_vm1, %v25_v13 }
 0x15c   :  { %v150_v14 = vpop.f32.mrb[0].mxu0 }
 0x15d   :  { %117 = vst.msk [vmem:[#allocation2 + $0x8] sm:$0xff] %vm115_vm4, %v150_v14  ;;  %v106_v15 = vpop.f32.mrb[1].mxu0 }
 0x15e   :  { %116 = vst.msk [vmem:[#allocation2] sm:$0xff] %vm115_vm4, %v106_v15 }
 0x15f   :  { %172 = shalt.err (!%p169_p4)
}
 0x160   :  { %s173_s22 = scalar_lea.hbm %s234_s2, 256 }
 0x161   :  { %p174_p5 = scmp.ne.s32.totalorder %s234_s2, %s173_s22  ;;  %p177_p6 = scmp.lt.u32.totalorder %s173_s22, %s234_s2 }
 0x163   :  { %p179_p7 = pnand %p177_p6, %p174_p5 }
 0x165   :  { %182 = shalt.err (!%p179_p7)
}
 0x166   :  { %s188_s27 = smov 128   ;;  %s189_s28 = smov 8  }
 0x167   :  { %129 = dma.vmem_to_hbm [thread:$0]  %s124_s19, 256, %s234_s2, [#allocation3], %s188_s27, %s188_s27, %s189_s28  }
 0x168   :  { %183 = dma.done.wait [#allocation3], 256  }
 0x169   :  { %184 = vsyncadd [#allocation3], 4294967040 }
 0x16a   :  { %133 = vsyncpa [#allocation3], 1 }

</bundles_post_ra>
